<compile_context>
chip_gen: v6e
topology: v6e:2x2x1
jax: 0.10.0
libtpu: 0.0.40
codegen_flags: <defaults>
</compile_context>

<pallas_src>
import functools
import math

import jax
import jax.numpy as jnp
import numpy as np
from jax.experimental import pallas as pl
from jax.experimental.pallas import tpu as pltpu

F32 = jnp.float32


# ----------------------------- Pallas kernel ------------------------------

def _temporal_embed_kernel(idx_ref, table_ref, out_ref, *, offsets, table_rows):
    """Fused lookup-and-sum.

    idx_ref:   (rows_blk, F) int32  -- per-row time-feature indices
    table_ref: (R, D)       f32     -- concatenated (row-padded) embedding tables
    out_ref:   (rows_blk, D) f32    -- sum of the F gathered embeddings
    """
    idx = idx_ref[...]                                             # (rows, F)
    rows_blk = idx.shape[0]

    # Lane iota over the (128-aligned) concatenated table rows.
    iota = jax.lax.broadcasted_iota(jnp.int32, (rows_blk, table_rows), 1)

    # Incremental multi-hot: one (rows, R) compare per feature, unrolled
    # (F <= 5, offsets are static Python ints -> no captured array constants).
    mh = jnp.zeros((rows_blk, table_rows), dtype=F32)
    for f, off in enumerate(offsets):
        gid = idx[:, f:f + 1] + off                                # (rows, 1)
        mh = mh + (gid == iota).astype(F32)

    # Gather + sum of all F embeddings == one MXU matmul, f32 all the way.
    out_ref[...] = jnp.dot(mh, table_ref[...],
                           preferred_element_type=F32,
                           precision=jax.lax.Precision.HIGHEST)


def _temporal_embedding_pallas(idx2d, table, offsets):
    rows, num_feats = idx2d.shape
    R, D = table.shape

    # Capped block size: multiple of 8, <= 1024 rows per grid step.
    MAX_BLOCK_ROWS = 1024
    block_rows = min(-(-rows // 8) * 8, MAX_BLOCK_ROWS)
    rows_pad = -(-rows // block_rows) * block_rows
    if rows_pad != rows:
        idx2d = jnp.pad(idx2d, ((0, rows_pad - rows), (0, 0)))
    grid = (rows_pad // block_rows,)

    kern = functools.partial(
        _temporal_embed_kernel,
        offsets=tuple(int(o) for o in offsets),
        table_rows=R,
    )
    out = pl.pallas_call(
        kern,
        out_shape=jax.ShapeDtypeStruct((rows_pad, D), F32),
        grid_spec=pltpu.PrefetchScalarGridSpec(
            num_scalar_prefetch=0,
            grid=grid,
            in_specs=[
                pl.BlockSpec((block_rows, num_feats), lambda i: (i, 0)),
                pl.BlockSpec((R, D), lambda i: (0, 0)),
            ],
            out_specs=pl.BlockSpec((block_rows, D), lambda i: (i, 0)),
        ),
        compiler_params=pltpu.CompilerParams(
            dimension_semantics=("parallel",)),
    )(idx2d, table)

    if rows_pad != rows:
        out = out[:rows]
    return out


# ------------------------- module-equivalent setup -------------------------

def _fixed_embedding_table(c_in, d_model):
    """FixedEmbedding weight: sinusoidal table, identical to the PyTorch ref."""
    w = np.zeros((c_in, d_model), dtype=np.float32)
    position = np.arange(0, c_in, dtype=np.float32)[:, None]
    div_term = np.exp(np.arange(0, d_model, 2, dtype=np.float32)
                      * -(math.log(10000.0) / d_model))
    w[:, 0::2] = np.sin(position * div_term)
    w[:, 1::2] = np.cos(position * div_term)
    return jnp.asarray(w)


class TemporalEmbedding:
    """JAX/Pallas equivalent of the PyTorch TemporalEmbedding module.

    x: (B, L, n_time_feats) with columns [month, day, weekday, hour, (minute)].
    Returns (B, L, d_model) = hour_emb + weekday_emb + day_emb + month_emb
    (+ minute_emb for data='ETTm').
    """

    def __init__(self, d_model, embed_type='fixed', data='ETTh', key=None):
        # Column order matches the reference indexing x[:, :, k].
        sizes = [('month', 13), ('day', 32), ('weekday', 7), ('hour', 24)]
        if data == 'ETTm':
            sizes.append(('minute', 4))

        if embed_type != 'fixed' and key is None:
            key = jax.random.PRNGKey(42)

        tabs, offsets, off = [], [], 0
        self.tables_split = {}
        for name, c_in in sizes:
            if embed_type == 'fixed':
                t = _fixed_embedding_table(c_in, d_model)
            else:  # learned path: same forward, nn.Embedding ~ N(0, 1) init
                key, sub = jax.random.split(key)
                t = jax.random.normal(sub, (c_in, d_model), dtype=F32)
            self.tables_split[name] = t
            tabs.append(t)
            offsets.append(off)
            off += c_in

        table = jnp.concatenate(tabs, axis=0)                   # (R, d_model)
        r = table.shape[0]
        r_pad = -(-r // 128) * 128                               # lane-align rows (K dim)
        if r_pad != r:
            table = jnp.pad(table, ((0, r_pad - r), (0, 0)))
        self.table = table
        self.offsets = tuple(offsets)
        self.num_feats = len(sizes)
        self.d_model = d_model

    def __call__(self, x):
        B, L, _ = x.shape
        idx = x[..., :self.num_feats].astype(jnp.int32)          # == x.long()
        idx = idx.reshape(B * L, self.num_feats)
        out = _temporal_embedding_pallas(idx, self.table, self.offsets)
        return out.reshape(B, L, self.d_model)


# ---------------------------------- main -----------------------------------

if __name__ == "__main__":
    B, L, D_MODEL = 2, 32, 128

    key = jax.random.PRNGKey(0)
    ks = jax.random.split(key, 5)
    month = jax.random.randint(ks[0], (B, L), 0, 13)
    day = jax.random.randint(ks[1], (B, L), 0, 32)
    weekday = jax.random.randint(ks[2], (B, L), 0, 7)
    hour = jax.random.randint(ks[3], (B, L), 0, 24)
    minute = jax.random.randint(ks[4], (B, L), 0, 4)
    # Reference passes float time-marks and casts with .long() inside forward.
    x = jnp.stack([month, day, weekday, hour, minute], axis=-1).astype(F32)

    emb = TemporalEmbedding(d_model=D_MODEL, embed_type='fixed', data='ETTh')
    fwd = jax.jit(lambda xin: emb(xin))
    out = jax.block_until_ready(fwd(x))
    assert out.shape == (B, L, D_MODEL)

    # Pure-JAX reference (plain gathers + sum), per the PyTorch forward.
    xi = x.astype(jnp.int32)
    ref = (emb.tables_split['hour'][xi[:, :, 3]]
           + emb.tables_split['weekday'][xi[:, :, 2]]
           + emb.tables_split['day'][xi[:, :, 1]]
           + emb.tables_split['month'][xi[:, :, 0]])
    assert jnp.allclose(out, ref, atol=1e-5, rtol=1e-5)

    print("KERNEL_OK")
</pallas_src>

<mosaic_0001>
module attributes {stable_mosaic.version = 11 : i64} {
  func.func @_temporal_embed_kernel(%arg0: i32, %arg1: memref<64x4xi32, #tpu.memory_space<vmem>>, %arg2: memref<128x128xf32, #tpu.memory_space<vmem>>, %arg3: memref<64x128xf32, #tpu.memory_space<vmem>>) attributes {dimension_semantics = [#tpu.dimension_semantics<parallel>], iteration_bounds = array<i64: 1>, scalar_prefetch = 0 : i64, scratch_operands = 0 : i64, tpu.core_type = #tpu.core_type<tc>, window_params = [{transform_indices = @transform_0, window_bounds = array<i64: 64, 4>}, {pipeline_mode = #tpu.pipeline_mode<synchronous>, transform_indices = @transform_1, window_bounds = array<i64: 128, 128>}, {transform_indices = @transform_2, window_bounds = array<i64: 64, 128>}]} {
    %c0 = arith.constant 0 : index
    %c0_0 = arith.constant 0 : index
    %0 = vector.load %arg1[%c0, %c0_0] : memref<64x4xi32, #tpu.memory_space<vmem>>, vector<64x4xi32>
    %1 = tpu.iota {dimensions = array<i32: 1>} : vector<64x128xi32>
    %cst = arith.constant 0.000000e+00 : f32
    %2 = vector.broadcast %cst : f32 to vector<64x128xf32>
    %3 = vector.extract_strided_slice %0 {offsets = [0, 0], sizes = [64, 1], strides = [1, 1]} : vector<64x4xi32> to vector<64x1xi32>
    %c0_i32 = arith.constant 0 : i32
    %4 = vector.broadcast %c0_i32 : i32 to vector<64x1xi32>
    %5 = arith.addi %3, %4 : vector<64x1xi32>
    %6 = vector.broadcast %5 : vector<64x1xi32> to vector<64x128xi32>
    %7 = arith.cmpi eq, %6, %1 : vector<64x128xi32>
    %8 = arith.extui %7 : vector<64x128xi1> to vector<64x128xi32>
    %9 = arith.sitofp %8 : vector<64x128xi32> to vector<64x128xf32>
    %10 = arith.addf %2, %9 : vector<64x128xf32>
    %11 = vector.extract_strided_slice %0 {offsets = [0, 1], sizes = [64, 1], strides = [1, 1]} : vector<64x4xi32> to vector<64x1xi32>
    %c13_i32 = arith.constant 13 : i32
    %12 = vector.broadcast %c13_i32 : i32 to vector<64x1xi32>
    %13 = arith.addi %11, %12 : vector<64x1xi32>
    %14 = vector.broadcast %13 : vector<64x1xi32> to vector<64x128xi32>
    %15 = arith.cmpi eq, %14, %1 : vector<64x128xi32>
    %16 = arith.extui %15 : vector<64x128xi1> to vector<64x128xi32>
    %17 = arith.sitofp %16 : vector<64x128xi32> to vector<64x128xf32>
    %18 = arith.addf %10, %17 : vector<64x128xf32>
    %19 = vector.extract_strided_slice %0 {offsets = [0, 2], sizes = [64, 1], strides = [1, 1]} : vector<64x4xi32> to vector<64x1xi32>
    %c45_i32 = arith.constant 45 : i32
    %20 = vector.broadcast %c45_i32 : i32 to vector<64x1xi32>
    %21 = arith.addi %19, %20 : vector<64x1xi32>
    %22 = vector.broadcast %21 : vector<64x1xi32> to vector<64x128xi32>
    %23 = arith.cmpi eq, %22, %1 : vector<64x128xi32>
    %24 = arith.extui %23 : vector<64x128xi1> to vector<64x128xi32>
    %25 = arith.sitofp %24 : vector<64x128xi32> to vector<64x128xf32>
    %26 = arith.addf %18, %25 : vector<64x128xf32>
    %27 = vector.extract_strided_slice %0 {offsets = [0, 3], sizes = [64, 1], strides = [1, 1]} : vector<64x4xi32> to vector<64x1xi32>
    %c52_i32 = arith.constant 52 : i32
    %28 = vector.broadcast %c52_i32 : i32 to vector<64x1xi32>
    %29 = arith.addi %27, %28 : vector<64x1xi32>
    %30 = vector.broadcast %29 : vector<64x1xi32> to vector<64x128xi32>
    %31 = arith.cmpi eq, %30, %1 : vector<64x128xi32>
    %32 = arith.extui %31 : vector<64x128xi1> to vector<64x128xi32>
    %33 = arith.sitofp %32 : vector<64x128xi32> to vector<64x128xf32>
    %34 = arith.addf %26, %33 : vector<64x128xf32>
    %c0_1 = arith.constant 0 : index
    %c0_2 = arith.constant 0 : index
    %35 = vector.load %arg2[%c0_1, %c0_2] : memref<128x128xf32, #tpu.memory_space<vmem>>, vector<128x128xf32>
    %cst_3 = arith.constant dense<0.000000e+00> : vector<64x128xf32>
    %36 = tpu.matmul %34, %35, %cst_3 {dimension_numbers = #tpu.dot_dimension_numbers<[1], [0], [0], [1], [0, 0, 1, 1], [], []>, precision = #tpu.contract_precision<fp32>} : vector<64x128xf32>, vector<128x128xf32>, vector<64x128xf32> -> vector<64x128xf32>
    %c0_4 = arith.constant 0 : index
    %c0_5 = arith.constant 0 : index
    %37 = vector.load %arg3[%c0_4, %c0_5] : memref<64x128xf32, #tpu.memory_space<vmem>>, vector<64x128xf32>
    tpu.vector_store %arg3[%c0_4, %c0_5], %36 {strides = array<i32>} : memref<64x128xf32, #tpu.memory_space<vmem>>, vector<64x128xf32>,
    return
  }
  func.func @transform_0(%arg0: i32) -> (i32, i32) {
    %c0_i32 = arith.constant 0 : i32
    %c0_i32_0 = arith.constant 0 : i32
    return %arg0, %c0_i32 : i32, i32
  }
  func.func @transform_1(%arg0: i32) -> (i32, i32) {
    %c0_i32 = arith.constant 0 : i32
    %c0_i32_0 = arith.constant 0 : i32
    %c0_i32_1 = arith.constant 0 : i32
    return %c0_i32, %c0_i32_0 : i32, i32
  }
  func.func @transform_2(%arg0: i32) -> (i32, i32) {
    %c0_i32 = arith.constant 0 : i32
    %c0_i32_0 = arith.constant 0 : i32
    return %arg0, %c0_i32 : i32, i32
  }
}

</mosaic_0001>

<bundles_post_ra>
// kernel: _lambda_.1
= control target key start
LH: loop header
LB: loop body
LE: loop exit
PB: predicated region body
PF: predicated region fallthrough
CT: control target
= control target key end

     0   :  { %7 = vsyncpa [#allocation3], 0  ;;  %s2410_s0 = inlined_call_operand.vmem [shape: s32[64,4], index: 0, kind: input, shape index: {}]   ;;  %s2411_s1 = inlined_call_operand.hbm [shape: f32[128,128], index: 1, kind: input, shape index: {}]   ;;  %s2412_s2 = inlined_call_operand.hbm [shape: f32[64,128], index: 2, kind: output, shape index: {}]  }
   0x1   :  { %8 = vsyncpa [#allocation4], 0  ;;  %s1780_s9 = smov [#allocation2]  }
   0x2   :  { %s16_s10 = sshll.u32 %s1780_s9, 4  ;;  %s17_s10 = int_to_ptr.vmem [resolvable:$true] %s16_s10 }
   0x3   :  { %s1744_s11 = scalar_lea.vmem %s17_s10, 2048  ;;  %p1749_p1 = scmp.lt.s32.totalorder %s17_s10, %s17_s10 }
   0x4   :  { %p1745_p0 = scmp.ne.s32.totalorder %s17_s10, %s1744_s11  ;;  %p1750_p2 = scmp.lt.s32.totalorder %s1744_s11, %s1744_s11 }
   0x6   :  { %p1751_p3 = por %p1750_p2, %p1749_p1 }
   0x8   :  { %p1752_p4 = pnand %p1751_p3, %p1745_p0 }
   0xa   :  { %1755 = shalt.err (!%p1752_p4)
}
   0xb   :  { %s1781_s12 = smov 128   ;;  %s1782_s13 = smov 8  }
   0xc   :  { %22 = dma.hbm_to_vmem [thread:$0]  %s2411_s1, 2048, %s17_s10, [#allocation3], %s1781_s12, %s1781_s12, %s1782_s13  }
   0xd   :  { %1776 = dma.done.wait [#allocation3], 2048  }
   0xe   :  { %1777 = vsyncadd [#allocation3], 4294965248  ;;  %v1783_v0 = vmov 0   ;;  %v2417_v1 = vmov 2   ;;  %v1815_v2 = vld [vmem:[%s2410_s0 + $0x8] sm:$0xff]  ;;  %v1822_v4 = vld [vmem:[%s2410_s0] sm:$0xff] }
   0xf   :  { %1716 = vset.pattern.permute.xlu1 %v1783_v0  ;;  %1719 = vset.pattern.permute.xlu0 %v2417_v1  ;;  %v157_v3 = vadd.s32 45, %v1815_v2  ;;  %v93_v5 = vadd.s32 13, %v1815_v2  ;;  %v92_v6 = vadd.s32 13, %v1822_v4  ;;  %v299_v7 = vld [vmem:[#allocation2 + $0x78] sm:$0xff]  ;;  %v298_v8 = vld [vmem:[#allocation2 + $0x70] sm:$0xff]  ;;  %v297_v9 = vld [vmem:[#allocation2 + $0x68] sm:$0xff] }
  0x10   :  { %40 = vperm.xlu1 %1716, %v1815_v2   ;;  %v2413_v10 = vmov 1   ;;  %v1830_v11 = vld [vmem:[%s2410_s0 + $0x18] sm:$0xff]  ;;  %v296_v12 = vld [vmem:[#allocation2 + $0x60] sm:$0xff]  ;;  %v156_v14 = vadd.s32 45, %v1822_v4  ;;  %v294_v15 = vld [vmem:[#allocation2 + $0x50] sm:$0xff]  ;;  %v1834_v16 = vand.u32 4294901760, %v299_v7 }
  0x11   :  { %168 = vperm.xlu0 %1719, %v157_v3   ;;  %v295_v13 = vld [vmem:[#allocation2 + $0x58] sm:$0xff]  ;;  %v1836_v17 = vand.u32 4294901760, %v298_v8  ;;  %v1838_v18 = vand.u32 4294901760, %v297_v9  ;;  %v1840_v19 = vand.u32 4294901760, %v296_v12  ;;  %v293_v20 = vld [vmem:[#allocation2 + $0x48] sm:$0xff]  ;;  %v95_v21 = vadd.s32 13, %v1830_v11 }
  0x12   :  { %v1843_v22 = vand.u32 4294901760, %v295_v13  ;;  %v1845_v23 = vand.u32 4294901760, %v294_v15  ;;  %v1848_v24 = vsub.f32 %v299_v7, %v1834_v16  ;;  %1443 = vmatprep.subr.mxu0 %v1834_v16  ;;  %v1865_v29 = vand.u32 4294901760, %v293_v20  ;;  %v292_v30 = vld [vmem:[#allocation2 + $0x40] sm:$0xff]  ;;  %v291_v37 = vld [vmem:[#allocation2 + $0x38] sm:$0xff]  ;;  %v290_v44 = vld [vmem:[#allocation2 + $0x30] sm:$0xff] }
  0x13   :  { %v1851_v25 = vsub.f32 %v298_v8, %v1836_v17  ;;  %v1854_v26 = vsub.f32 %v297_v9, %v1838_v18  ;;  %v1857_v27 = vsub.f32 %v296_v12, %v1840_v19  ;;  %1444 = vmatpush3.msra.mxu0 %v1834_v16  ;;  %v220_v35 = vadd.s32 52, %v1822_v4  ;;  %v289_v52 = vld [vmem:[#allocation2 + $0x28] sm:$0xff]  ;;  %v1921_v56 = vld [vmem:[%s2410_s0 + $0x10] sm:$0xff]  ;;  %v288_v58 = vld [vmem:[#allocation2 + $0x20] sm:$0xff] }
  0x14   :  { %1717 = vset.pattern.permute.xlu1 %v2413_v10  ;;  %v1862_v28 = vsub.f32 %v295_v13, %v1843_v22  ;;  %v1868_v31 = vand.u32 4294901760, %v1848_v24  ;;  %1445 = vmatprep.subr.mxu0 %v1836_v17  ;;  %v1882_v36 = vsub.f32 %v294_v15, %v1845_v23  ;;  %v1892_v41 = vand.u32 4294901760, %v292_v30  ;;  %v1950_v7 = vld [vmem:[%s2410_s0 + $0x20] sm:$0xff]  ;;  %v286_v9 = vld [vmem:[#allocation2 + $0x10] sm:$0xff] }
  0x15   :  { %104 = vperm.xlu1 %1717, %v93_v5   ;;  %1720 = vset.pattern.permute.xlu0 %v2413_v10  ;;  %v1871_v32 = vand.u32 4294901760, %v1851_v25  ;;  %v1874_v33 = vand.u32 4294901760, %v1854_v26  ;;  %v1877_v34 = vand.u32 4294901760, %v1857_v27  ;;  %v1898_v43 = vsub.f32 %v293_v20, %v1865_v29  ;;  %v285_v20 = vld [vmem:[#allocation2 + $0x8] sm:$0xff] }
  0x16   :  { %101 = vperm.xlu0 %1720, %v92_v6   ;;  %1446 = vmatpush3.msra.mxu0 %v1836_v17  ;;  %v465_v38 = vsub.f32 %v1848_v24, %v1868_v31  ;;  %v1895_v42 = vand.u32 4294901760, %v1862_v28  ;;  %v2415_v45 = vmov 3   ;;  %v1905_v49 = vand.u32 4294901760, %v291_v37 }
  0x17   :  { %v472_v39 = vsub.f32 %v1851_v25, %v1871_v32  ;;  %v479_v40 = vsub.f32 %v1854_v26, %v1874_v33  ;;  %1447 = vmatprep.subr.mxu0 %v1838_v18  ;;  %v486_v48 = vsub.f32 %v1857_v27, %v1877_v34  ;;  %v221_v50 = vadd.s32 52, %v1815_v2  ;;  %v287_v2 = vld [vmem:[#allocation2 + $0x18] sm:$0xff] }
  0x18   :  { %1448 = vmatpush3.msra.mxu0 %v1838_v18  ;;  %v466_v46 = vand.u32 4294901760, %v465_v38  ;;  %v1910_v51 = vand.u32 4294901760, %v1882_v36  ;;  %v1914_v54 = vsub.f32 %v292_v30, %v1892_v41  ;;  %v1916_v55 = vand.u32 4294901760, %v290_v44 }
  0x19   :  { %1718 = vset.pattern.permute.xlu1 %v2417_v1  ;;  %v473_v47 = vand.u32 4294901760, %v472_v39  ;;  %1449 = vmatprep.subr.mxu0 %v1840_v19  ;;  %v480_v53 = vand.u32 4294901760, %v479_v40  ;;  %v493_v57 = vsub.f32 %v1862_v28, %v1895_v42  ;;  %v487_v59 = vand.u32 4294901760, %v486_v48  ;;  %v1979_v39 = vld [vmem:[%s2410_s0 + $0x28] sm:$0xff] }
  0x1a   :  { %165 = vperm.xlu1 %1718, %v156_v14   ;;  %110 = vperm.xlu0 %1720, %v95_v21   ;;  %v1927_v60 = vand.u32 4294901760, %v1898_v43  ;;  %v1931_v61 = vsub.f32 %v291_v37, %v1905_v49  ;;  %v1933_v62 = vand.u32 4294901760, %v289_v52  ;;  %v500_v63 = vsub.f32 %v1882_v36, %v1910_v51 }
  0x1b   :  { %1487 = vmatprep.subr.mxu1 %v466_v46  ;;  %1450 = vmatpush3.msra.mxu0 %v1840_v19  ;;  %v94_v3 = vadd.s32 13, %v1921_v56  ;;  %v1943_v5 = vsub.f32 %v290_v44, %v1916_v55  ;;  %v1945_v6 = vand.u32 4294901760, %v288_v58  ;;  %v494_v8 = vand.u32 4294901760, %v493_v57 }
  0x1c   :  { %1488 = vmatpush3.msra.mxu1 %v466_v46  ;;  %1451 = vmatprep.subr.mxu0 %v1843_v22  ;;  %v507_v12 = vsub.f32 %v1898_v43, %v1927_v60  ;;  %v1956_v13 = vand.u32 4294901760, %v1931_v61  ;;  %v1960_v14 = vsub.f32 %v289_v52, %v1933_v62  ;;  %v1962_v15 = vand.u32 4294901760, %v287_v2 }
  0x1d   :  { %1489 = vmatprep.subr.mxu1 %v473_v47  ;;  %1452 = vmatpush3.msra.mxu0 %v1843_v22  ;;  %v501_v21 = vand.u32 4294901760, %v500_v63  ;;  %v1972_v37 = vsub.f32 %v288_v58, %v1945_v6  ;;  %v1974_v38 = vand.u32 4294901760, %v286_v9  ;;  %v1982_v40 = vand.u32 4294901760, %v285_v20 }
  0x1e   :  { %1721 = vset.pattern.permute.xlu1 %v2415_v45  ;;  %1724 = vset.pattern.permute.xlu0 %v1783_v0  ;;  %v508_v44 = vand.u32 4294901760, %v507_v12  ;;  %v521_v46 = vsub.f32 %v1931_v61, %v1956_v13  ;;  %v1991_v48 = vsub.f32 %v287_v2, %v1962_v15 }
  0x1f   :  { %229 = vperm.xlu1 %1721, %v220_v35   ;;  %37 = vperm.xlu0 %1724, %v1822_v4   ;;  %v1940_v4 = vand.u32 4294901760, %v1914_v54  ;;  %v1969_v35 = vand.u32 4294901760, %v1943_v5  ;;  %v1999_v57 = vand.u32 4294901760, %v1972_v37  ;;  %v2002_v58 = vsub.f32 %v286_v9, %v1974_v38 }
  0x20   :  { %1490 = vmatpush3.msra.mxu1 %v473_v47  ;;  %1453 = vmatprep.subr.mxu0 %v1845_v23  ;;  %v1988_v47 = vand.u32 4294901760, %v1960_v14  ;;  %v2012_v63 = vsub.f32 %v285_v20, %v1982_v40  ;;  %v522_v2 = vand.u32 4294901760, %v521_v46 }
  0x21   :  { %1491 = vmatprep.subr.mxu1 %v480_v53  ;;  %v514_v30 = vsub.f32 %v1914_v54, %v1940_v4  ;;  %1454 = vmatpush3.msra.mxu0 %v1845_v23  ;;  %v542_v20 = vsub.f32 %v1972_v37, %v1999_v57 }
  0x22   :  { %1492 = vmatpush3.msra.mxu1 %v480_v53  ;;  %1455 = vmatprep.subr.mxu0 %v1865_v29  ;;  %v528_v53 = vsub.f32 %v1943_v5, %v1969_v35 }
  0x23   :  { %232 = vperm.xlu1 %1721, %v221_v50   ;;  %43 = vperm.xlu0 %1724, %v1921_v56   ;;  %v284_v50 = vld [vmem:[#allocation2] sm:$0xff]  ;;  %v515_v52 = vand.u32 4294901760, %v514_v30  ;;  %v2033_v30 = vld [vmem:[%s2410_s0 + $0x38] sm:$0xff] }
  0x24   :  { %1493 = vmatprep.subr.mxu1 %v487_v59  ;;  %1456 = vmatpush3.msra.mxu0 %v1865_v29  ;;  %v2020_v9 = vand.u32 4294901760, %v284_v50  ;;  %v529_v12 = vand.u32 4294901760, %v528_v53 }
  0x25   :  { %1494 = vmatpush3.msra.mxu1 %v487_v59  ;;  %v2008_v59 = vld [vmem:[%s2410_s0 + $0x30] sm:$0xff]  ;;  %1457 = vmatprep.subr.mxu0 %v1892_v41  ;;  %s1788_s0 = smov [#allocation5]  }
  0x26   :  { %1495 = vmatprep.subr.mxu1 %v494_v8  ;;  %1458 = vmatpush3.msra.mxu0 %v1892_v41  ;;  %v2042_v45 = vsub.f32 %v284_v50, %v2020_v9  ;;  %s1255_s3 = sshll.u32 %s1788_s0, 4  ;;  %s1256_s3 = int_to_ptr.vmem [resolvable:$true] %s1255_s3 }
  0x27   :  { %1722 = vset.pattern.permute.xlu1 %v2413_v10  ;;  %49 = vperm.xlu0 %1724, %v1950_v7   ;;  %v2039_v10 = vand.u32 4294901760, %v2012_v63  ;;  %s1756_s4 = scalar_lea.vmem %s1256_s3, 1024  ;;  %p1761_p6 = scmp.lt.s32.totalorder %s1256_s3, %s1256_s3 }
  0x28   :  { %107 = vperm.xlu1 %1722, %v94_v3   ;;  %1496 = vmatpush3.msra.mxu1 %v494_v8  ;;  %v535_v3 = vsub.f32 %v1960_v14, %v1988_v47  ;;  %v2018_v8 = vand.u32 4294901760, %v1991_v48  ;;  %p1757_p5 = scmp.ne.s32.totalorder %s1256_s3, %s1756_s4  ;;  %p1762_p7 = scmp.lt.s32.totalorder %s1756_s4, %s1756_s4 }
  0x29   :  { %1497 = vmatprep.subr.mxu1 %v501_v21  ;;  %2433 = vst [vmem:[#allocation10_spill] sm:$0xff] %v2039_v10  ;;  %1459 = vmatprep.subr.mxu0 %v1905_v49  ;;  %v563_v50 = vsub.f32 %v2012_v63, %v2039_v10 }
  0x2a   :  { %1498 = vmatpush3.msra.mxu1 %v501_v21  ;;  %2431 = vst [vmem:[#allocation8_spill] sm:$0xff] %v2018_v8  ;;  %v2027_v21 = vand.u32 4294901760, %v2002_v58  ;;  %v536_v46 = vand.u32 4294901760, %v535_v3  ;;  %v549_v53 = vsub.f32 %v1991_v48, %v2018_v8  ;;  %1460 = vmatpush3.msra.mxu0 %v1905_v49  ;;  %v96_v8 = vadd.s32 13, %v1950_v7  ;;  %p1763_p8 = por %p1762_p7, %p1761_p6 }
  0x2b   :  { %52 = vperm.xlu0 %1724, %v1979_v39   ;;  %1499 = vmatprep.subr.mxu1 %v508_v44 }
  0x2c   :  { %1723 = vset.pattern.permute.xlu1 %v1783_v0  ;;  %v158_v0 = vadd.s32 45, %v1921_v56  ;;  %1500 = vmatpush3.msra.mxu1 %v508_v44  ;;  %2432 = vst [vmem:[#allocation9_spill] sm:$0xff] %v2027_v21  ;;  %v159_v44 = vadd.s32 45, %v1830_v11  ;;  %v550_v3 = vand.u32 4294901760, %v549_v53  ;;  %v564_v53 = vand.u32 4294901760, %v563_v50  ;;  %p1764_p9 = pnand %p1763_p8, %p1757_p5 }
  0x2d   :  { %46 = vperm.xlu1 %1723, %v1830_v11   ;;  %1501 = vmatprep.subr.mxu1 %v515_v52  ;;  %v224_v50 = vadd.s32 52, %v1950_v7 }
  0x2e   :  { %1502 = vmatpush3.msra.mxu1 %v515_v52  ;;  %v556_v52 = vsub.f32 %v2002_v58, %v2027_v21  ;;  %1461 = vmatprep.subr.mxu0 %v1916_v55 }
  0x2f   :  { %55 = vperm.xlu0 %1724, %v2008_v59   ;;  %1503 = vmatprep.subr.mxu1 %v522_v2 }
  0x30   :  { %1504 = vmatpush3.msra.mxu1 %v522_v2  ;;  %v2053_v2 = vand.u32 4294901760, %v2042_v45  ;;  %1462 = vmatpush3.msra.mxu0 %v1916_v55 }
  0x31   :  { %1725 = vset.pattern.permute.xlu1 %v2417_v1  ;;  %1505 = vmatprep.subr.mxu1 %v529_v12  ;;  %v543_v1 = vand.u32 4294901760, %v542_v20  ;;  %v2435_v20 = vmov 3  }
  0x32   :  { %171 = vperm.xlu1 %1725, %v158_v0   ;;  %v223_v0 = vadd.s32 52, %v1830_v11  ;;  %1506 = vmatpush3.msra.mxu1 %v529_v12  ;;  %2434 = vst [vmem:[#allocation11_spill] sm:$0xff] %v2053_v2  ;;  %v557_v11 = vand.u32 4294901760, %v556_v52  ;;  %v225_v12 = vadd.s32 52, %v1979_v39  ;;  %v570_v10 = vsub.f32 %v2042_v45, %v2053_v2 }
  0x33   :  { %58 = vperm.xlu0 %1724, %v2033_v30   ;;  %1507 = vmatprep.subr.mxu1 %v536_v46  ;;  %v226_v52 = vadd.s32 52, %v2008_v59 }
  0x34   :  { %1508 = vmatpush3.msra.mxu1 %v536_v46  ;;  %v222_v46 = vadd.s32 52, %v1921_v56  ;;  %1463 = vmatprep.subr.mxu0 %v1933_v62  ;;  %v2437_v56 = vmov 2  }
  0x35   :  { %1509 = vmatprep.subr.mxu1 %v543_v1  ;;  %1464 = vmatpush3.msra.mxu0 %v1933_v62 }
  0x36   :  { %174 = vperm.xlu1 %1725, %v159_v44   ;;  %1510 = vmatpush3.msra.mxu1 %v543_v1  ;;  %v2436_v44 = vmov 1   ;;  %v571_v1 = vand.u32 4294901760, %v570_v10  ;;  %v160_v10 = vadd.s32 45, %v1950_v7 }
  0x37   :  { %1732 = vset.pattern.permute.xlu0 %v2435_v20  ;;  %1511 = vmatprep.subr.mxu1 %v550_v3 }
  0x38   :  { %238 = vperm.xlu0 %1732, %v223_v0   ;;  %1512 = vmatpush3.msra.mxu1 %v550_v3  ;;  %v161_v0 = vadd.s32 45, %v1979_v39  ;;  %v98_v3 = vadd.s32 13, %v2008_v59 }
  0x39   :  { %1513 = vmatprep.subr.mxu1 %v557_v11  ;;  %1465 = vmatprep.subr.mxu0 %v1945_v6 }
  0x3a   :  { %1726 = vset.pattern.permute.xlu1 %v2436_v44  ;;  %1514 = vmatpush3.msra.mxu1 %v557_v11  ;;  %v99_v11 = vadd.s32 13, %v2033_v30 }
  0x3b   :  { %113 = vperm.xlu1 %1726, %v96_v8   ;;  %1515 = vmatprep.subr.mxu1 %v564_v53  ;;  %v97_v8 = vadd.s32 13, %v1979_v39  ;;  %v162_v39 = vadd.s32 45, %v2008_v59 }
  0x3c   :  { %244 = vperm.xlu0 %1732, %v225_v12   ;;  %1516 = vmatpush3.msra.mxu1 %v564_v53  ;;  %v163_v12 = vadd.s32 45, %v2033_v30  ;;  %v227_v53 = vadd.s32 52, %v2033_v30 }
  0x3d   :  { %1517 = vmatprep.subr.mxu1 %v571_v1  ;;  %1466 = vmatpush3.msra.mxu0 %v1945_v6 }
  0x3e   :  { %1518 = vmatpush3.msra.mxu1 %v571_v1  ;;  %1467 = vmatprep.subr.mxu0 %v1962_v15 }
  0x3f   :  { %1727 = vset.pattern.permute.xlu1 %v2435_v20  ;;  %1468 = vmatpush3.msra.mxu0 %v1962_v15 }
  0x40   :  { %235 = vperm.xlu1 %1727, %v222_v46   ;;  %247 = vperm.xlu0 %1732, %v226_v52   ;;  %v34_v52 = vlaneseq }
  0x41   :  { %1469 = vmatprep.subr.mxu0 %v1974_v38  ;;  %1575 = vmatprep.subr.mxu1 %v1834_v16 }
  0x42   :  { %1470 = vmatpush3.msra.mxu0 %v1974_v38 }
  0x43   :  { %1471 = vmatprep.subr.mxu0 %v1982_v40 }
  0x44   :  { %1728 = vset.pattern.permute.xlu1 %v2436_v44  ;;  %1472 = vmatpush3.msra.mxu0 %v1982_v40 }
  0x45   :  { %116 = vperm.xlu1 %1728, %v97_v8   ;;  %1473 = vmatprep.subr.mxu0 %v2020_v9 }
  0x46   :  { %1474 = vmatpush3.msra.mxu0 %v2020_v9 }
  0x47   :  { %1531 = vmatprep.subr.mxu0 %v1848_v24 }
  0x49   :  { %1729 = vset.pattern.permute.xlu1 %v2437_v56 }
  0x4a   :  { %177 = vperm.xlu1 %1729, %v160_v10  }
  0x4e   :  { %180 = vperm.xlu1 %1729, %v161_v0  }
  0x52   :  { %1730 = vset.pattern.permute.xlu1 %v2436_v44 }
  0x53   :  { %119 = vperm.xlu1 %1730, %v98_v3  }
  0x57   :  { %1731 = vset.pattern.permute.xlu1 %v2435_v20 }
  0x58   :  { %241 = vperm.xlu1 %1731, %v224_v50  }
  0x5c   :  { %1733 = vset.pattern.permute.xlu1 %v2436_v44  ;;  %v2096_v44 = vand.u32 127, %v34_v52 }
  0x5d   :  { %122 = vperm.xlu1 %1733, %v99_v11  }
  0x61   :  { %1734 = vset.pattern.permute.xlu1 %v2437_v56  ;;  %v1787_v56 = vmov 0.0  }
  0x62   :  { %183 = vperm.xlu1 %1734, %v162_v39  }
  0x66   :  { %186 = vperm.xlu1 %1734, %v163_v12  }
  0x6a   :  { %1735 = vset.pattern.permute.xlu1 %v2435_v20 }
  0x6b   :  { %250 = vperm.xlu1 %1735, %v227_v53  }
  0x8b   :  { %v41_v7 = vpop.permute.xlu1 %40 }
  0x8c   :  { %v169_v46 = vpop.permute.xlu0 %168  ;;  %vm61_vm1 = vcmp.eq.s32.totalorder %v41_v7, %v2096_v44 }
  0x8d   :  { %vm189_vm3 = vcmp.eq.s32.totalorder %v169_v46, %v2096_v44  ;;  %v1268_v30 = vsel %vm61_vm1, 1.0, %v1787_v56 }
  0x8e   :  { %v1284_v39 = vsel %vm189_vm3, 1.0, %v1787_v56 }
  0x90   :  { %v105_v1 = vpop.permute.xlu1 %104 }
  0x91   :  { %v102_v8 = vpop.permute.xlu0 %101  ;;  %vm125_vm0 = vcmp.eq.s32.totalorder %v105_v1, %v2096_v44 }
  0x92   :  { %v1276_v0 = vsel %vm125_vm0, 1.0, %v1787_v56  ;;  %vm124_vm2 = vcmp.eq.s32.totalorder %v102_v8, %v2096_v44 }
  0x93   :  { %v149_v3 = vadd.f32 %v1276_v0, %v1268_v30  ;;  %v1275_v50 = vsel %vm124_vm2, 1.0, %v1787_v56 }
  0x95   :  { %v166_v59 = vpop.permute.xlu1 %165  ;;  %v111_v10 = vpop.permute.xlu0 %110  ;;  %v213_v52 = vadd.f32 %v1284_v39, %v149_v3 }
  0x96   :  { %vm188_vm4 = vcmp.eq.s32.totalorder %v166_v59, %v2096_v44  ;;  %vm127_vm8 = vcmp.eq.s32.totalorder %v111_v10, %v2096_v44 }
  0x97   :  { %v1283_v46 = vsel %vm188_vm4, 1.0, %v1787_v56 }
  0x9a   :  { %v230_v20 = vpop.permute.xlu1 %229  ;;  %v38_v11 = vpop.permute.xlu0 %37 }
  0x9b   :  { %vm60_vm5 = vcmp.eq.s32.totalorder %v38_v11, %v2096_v44  ;;  %vm252_vm6 = vcmp.eq.s32.totalorder %v230_v20, %v2096_v44 }
  0x9c   :  { %v1267_v12 = vsel %vm60_vm5, 1.0, %v1787_v56  ;;  %v1291_v59 = vsel %vm252_vm6, 1.0, %v1787_v56 }
  0x9d   :  { %v148_v53 = vadd.f32 %v1275_v50, %v1267_v12 }
  0x9e   :  { %v233_v7 = vpop.permute.xlu1 %232  ;;  %v2112_v1 = vpop.permute.xlu0 %43 }
  0x9f   :  { %vm253_vm7 = vcmp.eq.s32.totalorder %v233_v7, %v2096_v44  ;;  %v212_v8 = vadd.f32 %v1283_v46, %v148_v53  ;;  %vm62_vm11 = vcmp.eq.s32.totalorder %v2112_v1, %v2096_v44 }
  0xa0   :  { %v1292_v0 = vsel %vm253_vm7, 1.0, %v1787_v56 }
  0xa1   :  { %v277_v30 = vadd.f32 %v1292_v0, %v213_v52  ;;  %v276_v11 = vadd.f32 %v1291_v59, %v212_v8 }
  0xa2   :  { %v2118_v20 = vpop.permute.xlu0 %49 }
  0xa3   :  { %v2116_v2 = vand.u32 4294901760, %v277_v30  ;;  %v108_v21 = vpop.permute.xlu1 %107  ;;  %v2120_v50 = vand.u32 4294901760, %v276_v11  ;;  %vm64_vm4 = vcmp.eq.s32.totalorder %v2118_v20, %v2096_v44 }
  0xa4   :  { %vm126_vm12 = vcmp.eq.s32.totalorder %v108_v21, %v2096_v44 }
  0xa5   :  { %2438 = vst [vmem:[#allocation12_spill] sm:$0xff] %v2116_v2  ;;  %v2123_v3 = vsub.f32 %v277_v30, %v2116_v2  ;;  %1519 = vmatprep.mubr.f32.mxu1 %v2120_v50  ;;  %v2127_v39 = vsub.f32 %v276_v11, %v2120_v50  ;;  %v1277_v21 = vsel %vm126_vm12, 1.0, %v1787_v56 }
  0xa6   :  { %1520 = vmatmul.mubr.f32.vlgmr.msra.gmra.mxu1 %v2116_v2  ;;  %v2130_v12 = vpop.permute.xlu0 %52 }
  0xa7   :  { %v2427_v53 = vand.u32 4294901760, %v2123_v3  ;;  %v2428_v46 = vand.u32 4294901760, %v2127_v39  ;;  %1576 = vmatpush3.msra.mxu1 %v1834_v16  ;;  %vm65_vm0 = vcmp.eq.s32.totalorder %v2130_v12, %v2096_v44 }
  0xa8   :  { %v47_v7 = vpop.permute.xlu1 %46  ;;  %1577 = vmatprep.subr.mxu1 %v1836_v17 }
  0xa9   :  { %v394_v52 = vsub.f32 %v2123_v3, %v2427_v53  ;;  %v384_v8 = vsub.f32 %v2127_v39, %v2428_v46  ;;  %1578 = vmatpush3.msra.mxu1 %v1836_v17  ;;  %vm63_vm9 = vcmp.eq.s32.totalorder %v47_v7, %v2096_v44  ;;  %v1278_v53 = vsel %vm127_vm8, 1.0, %v1787_v56 }
  0xaa   :  { %v2143_v0 = vpop.permute.xlu0 %55  ;;  %1579 = vmatprep.subr.mxu1 %v1838_v18  ;;  %v1270_v46 = vsel %vm63_vm9, 1.0, %v1787_v56 }
  0xab   :  { %v385_v59 = vand.u32 4294901760, %v384_v8  ;;  %1580 = vmatpush3.msra.mxu1 %v1838_v18  ;;  %v395_v11 = vand.u32 4294901760, %v394_v52  ;;  %v151_v7 = vadd.f32 %v1278_v53, %v1270_v46  ;;  %vm66_vm9 = vcmp.eq.s32.totalorder %v2143_v0, %v2096_v44 }
  0xac   :  { %1581 = vmatprep.subr.mxu1 %v1840_v19 }
  0xad   :  { %v172_v30 = vpop.permute.xlu1 %171  ;;  %1475 = vmatprep.mubr.f32.mxu0 %v385_v59  ;;  %1582 = vmatpush3.msra.mxu1 %v1840_v19 }
  0xae   :  { %1476 = vmatmul.mubr.f32.vlgmr.msra.gmra.mxu0 %v395_v11  ;;  %v2153_v2 = vpop.permute.xlu0 %58  ;;  %1583 = vmatprep.subr.mxu1 %v1843_v22  ;;  %vm190_vm14 = vcmp.eq.s32.totalorder %v172_v30, %v2096_v44 }
  0xaf   :  { %1532 = vmatpush3.msra.mxu0 %v1848_v24  ;;  %1584 = vmatpush3.msra.mxu1 %v1843_v22  ;;  %v1285_v46 = vsel %vm190_vm14, 1.0, %v1787_v56 }
  0xb0   :  { %1533 = vmatprep.subr.mxu0 %v1851_v25  ;;  %1585 = vmatprep.subr.mxu1 %v1845_v23 }
  0xb1   :  { %v175_v10 = vpop.permute.xlu1 %174  ;;  %1534 = vmatpush3.msra.mxu0 %v1851_v25  ;;  %1586 = vmatpush3.msra.mxu1 %v1845_v23 }
  0xb2   :  { %vm191_vm10 = vcmp.eq.s32.totalorder %v175_v10, %v2096_v44  ;;  %1535 = vmatprep.subr.mxu0 %v1854_v26  ;;  %1587 = vmatprep.subr.mxu1 %v1865_v29 }
  0xb3   :  { %v1286_v52 = vsel %vm191_vm10, 1.0, %v1787_v56  ;;  %v239_v8 = vpop.permute.xlu0 %238  ;;  %1536 = vmatpush3.msra.mxu0 %v1854_v26  ;;  %1588 = vmatpush3.msra.mxu1 %v1865_v29  ;;  %v1269_v26 = vsel %vm62_vm11, 1.0, %v1787_v56 }
  0xb4   :  { %v215_v24 = vadd.f32 %v1286_v52, %v151_v7  ;;  %vm255_vm13 = vcmp.eq.s32.totalorder %v239_v8, %v2096_v44  ;;  %1537 = vmatprep.subr.mxu0 %v1857_v27  ;;  %1589 = vmatprep.subr.mxu1 %v1892_v41 }
  0xb5   :  { %v1294_v25 = vsel %vm255_vm13, 1.0, %v1787_v56  ;;  %1538 = vmatpush3.msra.mxu0 %v1857_v27  ;;  %1590 = vmatpush3.msra.mxu1 %v1892_v41  ;;  %v150_v27 = vadd.f32 %v1277_v21, %v1269_v26  ;;  %vm67_vm13 = vcmp.eq.s32.totalorder %v2153_v2, %v2096_v44 }
  0xb6   :  { %v2176_v53 = vpop.permute.xlu1 %113  ;;  %v279_v1 = vadd.f32 %v1294_v25, %v215_v24  ;;  %1539 = vmatprep.subr.mxu0 %v1862_v28  ;;  %1591 = vmatprep.subr.mxu1 %v1905_v49 }
  0xb7   :  { %1540 = vmatpush3.msra.mxu0 %v1862_v28  ;;  %1592 = vmatpush3.msra.mxu1 %v1905_v49  ;;  %v214_v28 = vadd.f32 %v1285_v46, %v150_v27  ;;  %v245_v8 = vpop.permute.xlu0 %244  ;;  %vm128_vm5 = vcmp.eq.s32.totalorder %v2176_v53, %v2096_v44 }
  0xb8   :  { %v2187_v59 = vand.u32 4294901760, %v279_v1  ;;  %1541 = vmatprep.subr.mxu0 %v1882_v36  ;;  %1593 = vmatprep.subr.mxu1 %v1916_v55  ;;  %vm257_vm2 = vcmp.eq.s32.totalorder %v245_v8, %v2096_v44 }
  0xb9   :  { %1542 = vmatpush3.msra.mxu0 %v1882_v36  ;;  %1594 = vmatpush3.msra.mxu1 %v1916_v55  ;;  %v1296_v27 = vsel %vm257_vm2, 1.0, %v1787_v56 }
  0xba   :  { %1543 = vmatprep.subr.mxu0 %v1898_v43  ;;  %1595 = vmatprep.subr.mxu1 %v1933_v62  ;;  %v2199_v11 = vsub.f32 %v279_v1, %v2187_v59 }
  0xbb   :  { %v236_v30 = vpop.permute.xlu1 %235  ;;  %1544 = vmatpush3.msra.mxu0 %v1898_v43  ;;  %1596 = vmatpush3.msra.mxu1 %v1933_v62 }
  0xbc   :  { %vm254_vm15 = vcmp.eq.s32.totalorder %v236_v30, %v2096_v44  ;;  %1545 = vmatprep.subr.mxu0 %v1914_v54  ;;  %1597 = vmatprep.subr.mxu1 %v1945_v6  ;;  %v413_v52 = vand.u32 4294901760, %v2199_v11 }
  0xbd   :  { %v1293_v10 = vsel %vm254_vm15, 1.0, %v1787_v56  ;;  %1546 = vmatpush3.msra.mxu0 %v1914_v54  ;;  %1598 = vmatpush3.msra.mxu1 %v1945_v6 }
  0xbe   :  { %v278_v36 = vadd.f32 %v1293_v10, %v214_v28  ;;  %1547 = vmatprep.subr.mxu0 %v1931_v61  ;;  %1599 = vmatprep.subr.mxu1 %v1962_v15  ;;  %v1271_v28 = vsel %vm64_vm4, 1.0, %v1787_v56  ;;  %v1279_v10 = vsel %vm128_vm5, 1.0, %v1787_v56 }
  0xbf   :  { %1548 = vmatpush3.msra.mxu0 %v1931_v61  ;;  %1600 = vmatpush3.msra.mxu1 %v1962_v15 }
  0xc0   :  { %v2208_v43 = vand.u32 4294901760, %v278_v36  ;;  %v117_v7 = vpop.permute.xlu1 %116  ;;  %1549 = vmatprep.subr.mxu0 %v1943_v5  ;;  %1601 = vmatprep.subr.mxu1 %v1974_v38 }
  0xc1   :  { %1550 = vmatpush3.msra.mxu0 %v1943_v5  ;;  %vm129_vm1 = vcmp.eq.s32.totalorder %v117_v7, %v2096_v44  ;;  %1602 = vmatpush3.msra.mxu1 %v1974_v38  ;;  %v414_v5 = vsub.f32 %v2199_v11, %v413_v52 }
  0xc2   :  { %v2216_v54 = vsub.f32 %v278_v36, %v2208_v43  ;;  %1522 = vmatprep.mubr.f32.mxu1 %v2208_v43  ;;  %1551 = vmatprep.subr.mxu0 %v1960_v14  ;;  %v1280_v25 = vsel %vm129_vm1, 1.0, %v1787_v56  ;;  %v152_v36 = vadd.f32 %v1279_v10, %v1271_v28 }
  0xc3   :  { %1523 = vmatmul.mubr.f32.gmra.mxu1 %v2187_v59  ;;  %1552 = vmatpush3.msra.mxu0 %v1960_v14  ;;  %v1272_v14 = vsel %vm65_vm0, 1.0, %v1787_v56  ;;  %v415_v1 = vand.u32 4294901760, %v414_v5 }
  0xc4   :  { %v403_v61 = vand.u32 4294901760, %v2216_v54  ;;  %1603 = vmatprep.subr.mxu1 %v1982_v40  ;;  %1553 = vmatprep.subr.mxu0 %v1972_v37 }
  0xc5   :  { %v178_v24 = vpop.permute.xlu1 %177  ;;  %1604 = vmatpush3.msra.mxu1 %v1982_v40  ;;  %1554 = vmatpush3.msra.mxu0 %v1972_v37  ;;  %v153_v37 = vadd.f32 %v1280_v25, %v1272_v14 }
  0xc6   :  { %v404_v12 = vsub.f32 %v2216_v54, %v403_v61  ;;  %1605 = vmatprep.subr.mxu1 %v2020_v9  ;;  %1555 = vmatprep.subr.mxu0 %v1991_v48  ;;  %vm192_vm6 = vcmp.eq.s32.totalorder %v178_v24, %v2096_v44 }
  0xc7   :  { %1606 = vmatpush3.msra.mxu1 %v2020_v9  ;;  %1556 = vmatpush3.msra.mxu0 %v1991_v48  ;;  %v1287_v20 = vsel %vm192_vm6, 1.0, %v1787_v56 }
  0xc8   :  { %v405_v26 = vand.u32 4294901760, %v404_v12  ;;  %1663 = vmatprep.subr.mxu1 %v1834_v16  ;;  %1557 = vmatprep.subr.mxu0 %v2002_v58  ;;  %v216_v7 = vadd.f32 %v1287_v20, %v152_v36 }
  0xc9   :  { %v181_v21 = vpop.permute.xlu1 %180  ;;  %1558 = vmatpush3.msra.mxu0 %v2002_v58 }
  0xca   :  { %vm193_vm3 = vcmp.eq.s32.totalorder %v181_v21, %v2096_v44  ;;  %1478 = vmatprep.mubr.f32.mxu0 %v405_v26  ;;  %1559 = vmatprep.subr.mxu0 %v2012_v63  ;;  %v248_v21 = vpop.permute.xlu0 %247 }
  0xcb   :  { %v1288_v46 = vsel %vm193_vm3, 1.0, %v1787_v56  ;;  %1479 = vmatmul.mubr.f32.gmra.mxu0 %v415_v1  ;;  %vm258_vm11 = vcmp.eq.s32.totalorder %v248_v21, %v2096_v44 }
  0xcc   :  { %v217_v48 = vadd.f32 %v1288_v46, %v153_v37  ;;  %1560 = vmatpush3.msra.mxu0 %v2012_v63  ;;  %v1273_v37 = vsel %vm66_vm9, 1.0, %v1787_v56  ;;  %v1297_v10 = vsel %vm258_vm11, 1.0, %v1787_v56 }
  0xcd   :  { %1561 = vmatprep.subr.mxu0 %v2042_v45 }
  0xce   :  { %v281_v58 = vadd.f32 %v1296_v27, %v217_v48  ;;  %v120_v30 = vpop.permute.xlu1 %119  ;;  %1562 = vmatpush3.msra.mxu0 %v2042_v45 }
  0xcf   :  { %1619 = vmatprep.subr.mxu0 %v1868_v31  ;;  %vm130_vm8 = vcmp.eq.s32.totalorder %v120_v30, %v2096_v44 }
  0xd0   :  { %v2264_v53 = vand.u32 4294901760, %v281_v58  ;;  %v1281_v26 = vsel %vm130_vm8, 1.0, %v1787_v56 }
  0xd1   :  { %v154_v0 = vadd.f32 %v1281_v26, %v1273_v37 }
  0xd2   :  { %v2268_v24 = vsub.f32 %v281_v58, %v2264_v53 }
  0xd3   :  { %v242_v63 = vpop.permute.xlu1 %241 }
  0xd4   :  { %vm256_vm7 = vcmp.eq.s32.totalorder %v242_v63, %v2096_v44  ;;  %v433_v14 = vand.u32 4294901760, %v2268_v24 }
  0xd5   :  { %v1295_v45 = vsel %vm256_vm7, 1.0, %v1787_v56 }
  0xd6   :  { %v280_v5 = vadd.f32 %v1295_v45, %v216_v7  ;;  %v434_v27 = vsub.f32 %v2268_v24, %v433_v14  ;;  %v1274_v45 = vsel %vm67_vm13, 1.0, %v1787_v56 }
  0xd8   :  { %v2272_v8 = vand.u32 4294901760, %v280_v5  ;;  %v123_v12 = vpop.permute.xlu1 %122  ;;  %v435_v36 = vand.u32 4294901760, %v434_v27 }
  0xd9   :  { %vm131_vm12 = vcmp.eq.s32.totalorder %v123_v12, %v2096_v44 }
  0xda   :  { %v2278_v25 = vsub.f32 %v280_v5, %v2272_v8  ;;  %1525 = vmatprep.mubr.f32.mxu1 %v2272_v8  ;;  %v1282_v63 = vsel %vm131_vm12, 1.0, %v1787_v56 }
  0xdb   :  { %1526 = vmatmul.mubr.f32.gmra.mxu1 %v2264_v53  ;;  %v155_v26 = vadd.f32 %v1282_v63, %v1274_v45 }
  0xdc   :  { %v423_v1 = vand.u32 4294901760, %v2278_v25 }
  0xdd   :  { %v184_v46 = vpop.permute.xlu1 %183 }
  0xde   :  { %vm194_vm10 = vcmp.eq.s32.totalorder %v184_v46, %v2096_v44  ;;  %v424_v48 = vsub.f32 %v2278_v25, %v423_v1 }
  0xdf   :  { %v1289_v58 = vsel %vm194_vm10, 1.0, %v1787_v56 }
  0xe0   :  { %v218_v30 = vadd.f32 %v1289_v58, %v154_v0  ;;  %v425_v28 = vand.u32 4294901760, %v424_v48 }
  0xe1   :  { %v187_v20 = vpop.permute.xlu1 %186 }
  0xe2   :  { %v282_v7 = vadd.f32 %v1297_v10, %v218_v30  ;;  %vm195_vm14 = vcmp.eq.s32.totalorder %v187_v20, %v2096_v44  ;;  %1481 = vmatprep.mubr.f32.mxu0 %v425_v28  ;;  %v2439_v10 = vand.u32 4294901760, %v2127_v39 }
  0xe3   :  { %1482 = vmatmul.mubr.f32.gmra.mxu0 %v435_v36  ;;  %v1290_v12 = vsel %vm195_vm14, 1.0, %v1787_v56  ;;  %v2440_v36 = vand.u32 4294901760, %v2123_v3 }
  0xe4   :  { %v2299_v5 = vand.u32 4294901760, %v282_v7  ;;  %v219_v37 = vadd.f32 %v1290_v12, %v155_v26 }
  0xe6   :  { %v442_v2 = vsub.f32 %v282_v7, %v2299_v5  ;;  %v251_v21 = vpop.permute.xlu1 %250  ;;  %1528 = vmatprep.mubr.f32.mxu1 %v2299_v5 }
  0xe7   :  { %vm259_vm15 = vcmp.eq.s32.totalorder %v251_v21, %v2096_v44 }
  0xe8   :  { %v1298_v46 = vsel %vm259_vm15, 1.0, %v1787_v56  ;;  %v443_v27 = vand.u32 4294901760, %v442_v2 }
  0xe9   :  { %v283_v0 = vadd.f32 %v1298_v46, %v219_v37 }
  0xea   :  { %v444_v48 = vsub.f32 %v442_v2, %v443_v27 }
  0xeb   :  { %v2306_v58 = vand.u32 4294901760, %v283_v0 }
  0xec   :  { %v445_v30 = vand.u32 4294901760, %v444_v48 }
  0xed   :  { %v452_v28 = vsub.f32 %v283_v0, %v2306_v58  ;;  %1529 = vmatmul.mubr.f32.gmra.mxu1 %v2306_v58 }
  0xee   :  { %1484 = vmatprep.mubr.f32.mxu0 %v445_v30  ;;  %1607 = vmatprep.mubr.f32.mxu1 %v2439_v10 }
  0xef   :  { %v453_v20 = vand.u32 4294901760, %v452_v28 }
  0xf1   :  { %1608 = vmatmul.mubr.f32.vlgmr.msra.gmra.mxu1 %v2440_v36  ;;  %v454_v44 = vsub.f32 %v452_v28, %v453_v20 }
  0xf2   :  { %1664 = vmatpush3.msra.mxu1 %v1834_v16  ;;  %1610 = vmatprep.mubr.f32.mxu1 %v403_v61  ;;  %v2441_v16 = vld [vmem:[#allocation8_spill] sm:$0xff] }
  0xf3   :  { %1665 = vmatprep.subr.mxu1 %v1836_v17  ;;  %v455_v56 = vand.u32 4294901760, %v454_v44 }
  0xf4   :  { %1666 = vmatpush3.msra.mxu1 %v1836_v17  ;;  %v2442_v17 = vld [vmem:[#allocation12_spill] sm:$0xff] }
  0xf5   :  { %1667 = vmatprep.subr.mxu1 %v1838_v18  ;;  %1485 = vmatmul.mubr.f32.gmra.mxu0 %v455_v56 }
  0xf6   :  { %1611 = vmatmul.mubr.f32.gmra.mxu1 %v413_v52  ;;  %1563 = vmatprep.mubr.f32.mxu0 %v2127_v39 }
  0xf7   :  { %1668 = vmatpush3.msra.mxu1 %v1838_v18  ;;  %1613 = vmatprep.mubr.f32.mxu1 %v423_v1  ;;  %v2443_v18 = vld [vmem:[#allocation9_spill] sm:$0xff] }
  0xf8   :  { %1669 = vmatprep.subr.mxu1 %v1840_v19 }
  0xf9   :  { %1670 = vmatpush3.msra.mxu1 %v1840_v19  ;;  %1564 = vmatmul.mubr.f32.vlgmr.msra.gmra.mxu0 %v2123_v3  ;;  %v2444_v19 = vld [vmem:[#allocation10_spill] sm:$0xff] }
  0xfa   :  { %1671 = vmatprep.subr.mxu1 %v1843_v22  ;;  %1614 = vmatmul.mubr.f32.gmra.mxu1 %v433_v14 }
  0xfb   :  { %1620 = vmatpush3.msra.mxu0 %v1868_v31  ;;  %1672 = vmatpush3.msra.mxu1 %v1843_v22  ;;  %v2445_v22 = vld [vmem:[#allocation11_spill] sm:$0xff] }
  0xfc   :  { %1566 = vmatprep.mubr.f32.mxu0 %v2216_v54  ;;  %1616 = vmatprep.mubr.f32.mxu1 %v443_v27 }
  0xfd   :  { %1621 = vmatprep.subr.mxu0 %v1871_v32  ;;  %1673 = vmatprep.subr.mxu1 %v1845_v23 }
  0xfe   :  { %1622 = vmatpush3.msra.mxu0 %v1871_v32  ;;  %1674 = vmatpush3.msra.mxu1 %v1845_v23 }
  0xff   :  { %1623 = vmatprep.subr.mxu0 %v1874_v33  ;;  %1675 = vmatprep.subr.mxu1 %v1865_v29 }
 0x100   :  { %1567 = vmatmul.mubr.f32.gmra.mxu0 %v2199_v11  ;;  %1617 = vmatmul.mubr.f32.gmra.mxu1 %v453_v20 }
 0x101   :  { %1624 = vmatpush3.msra.mxu0 %v1874_v33  ;;  %1676 = vmatpush3.msra.mxu1 %v1865_v29 }
 0x102   :  { %1569 = vmatprep.mubr.f32.mxu0 %v2278_v25  ;;  %1625 = vmatprep.subr.mxu0 %v1877_v34 }
 0x103   :  { %1677 = vmatprep.subr.mxu1 %v1892_v41  ;;  %1695 = vmatprep.mubr.f32.mxu1 %v2120_v50 }
 0x104   :  { %1626 = vmatpush3.msra.mxu0 %v1877_v34  ;;  %1678 = vmatpush3.msra.mxu1 %v1892_v41 }
 0x105   :  { %1627 = vmatprep.subr.mxu0 %v1895_v42  ;;  %1679 = vmatprep.subr.mxu1 %v1905_v49 }
 0x106   :  { %1570 = vmatmul.mubr.f32.gmra.mxu0 %v2268_v24  ;;  %1680 = vmatpush3.msra.mxu1 %v1905_v49 }
 0x107   :  { %1628 = vmatpush3.msra.mxu0 %v1895_v42  ;;  %1572 = vmatprep.mubr.f32.mxu0 %v442_v2 }
 0x108   :  { %1629 = vmatprep.subr.mxu0 %v1910_v51  ;;  %1681 = vmatprep.subr.mxu1 %v1916_v55 }
 0x109   :  { %1630 = vmatpush3.msra.mxu0 %v1910_v51  ;;  %1682 = vmatpush3.msra.mxu1 %v1916_v55 }
 0x10a   :  { %1631 = vmatprep.subr.mxu0 %v1927_v60  ;;  %1683 = vmatprep.subr.mxu1 %v1933_v62 }
 0x10b   :  { %1573 = vmatmul.mubr.f32.gmra.mxu0 %v452_v28  ;;  %1684 = vmatpush3.msra.mxu1 %v1933_v62 }
 0x10c   :  { %1632 = vmatpush3.msra.mxu0 %v1927_v60  ;;  %1651 = vmatprep.mubr.f32.mxu0 %v2120_v50 }
 0x10d   :  { %1633 = vmatprep.subr.mxu0 %v1940_v4  ;;  %1685 = vmatprep.subr.mxu1 %v1945_v6 }
 0x10e   :  { %1634 = vmatpush3.msra.mxu0 %v1940_v4  ;;  %1686 = vmatpush3.msra.mxu1 %v1945_v6 }
 0x10f   :  { %1635 = vmatprep.subr.mxu0 %v1956_v13  ;;  %1687 = vmatprep.subr.mxu1 %v1962_v15 }
 0x110   :  { %1636 = vmatpush3.msra.mxu0 %v1956_v13  ;;  %1688 = vmatpush3.msra.mxu1 %v1962_v15 }
 0x111   :  { %1637 = vmatprep.subr.mxu0 %v1969_v35  ;;  %1689 = vmatprep.subr.mxu1 %v1974_v38 }
 0x112   :  { %1638 = vmatpush3.msra.mxu0 %v1969_v35  ;;  %1690 = vmatpush3.msra.mxu1 %v1974_v38 }
 0x113   :  { %1639 = vmatprep.subr.mxu0 %v1988_v47  ;;  %1691 = vmatprep.subr.mxu1 %v1982_v40 }
 0x114   :  { %1640 = vmatpush3.msra.mxu0 %v1988_v47  ;;  %1692 = vmatpush3.msra.mxu1 %v1982_v40 }
 0x115   :  { %1641 = vmatprep.subr.mxu0 %v1999_v57  ;;  %1693 = vmatprep.subr.mxu1 %v2020_v9 }
 0x116   :  { %1642 = vmatpush3.msra.mxu0 %v1999_v57  ;;  %1694 = vmatpush3.msra.mxu1 %v2020_v9 }
 0x117   :  { %1643 = vmatprep.subr.mxu0 %v2441_v16  ;;  %1696 = vmatmul.mubr.f32.vlgmr.msra.gmra.mxu1 %v2442_v17 }
 0x118   :  { %1644 = vmatpush3.msra.mxu0 %v2441_v16  ;;  %1698 = vmatprep.mubr.f32.mxu1 %v2208_v43 }
 0x119   :  { %1645 = vmatprep.subr.mxu0 %v2443_v18 }
 0x11a   :  { %1646 = vmatpush3.msra.mxu0 %v2443_v18 }
 0x11b   :  { %1647 = vmatprep.subr.mxu0 %v2444_v19  ;;  %1699 = vmatmul.mubr.f32.gmra.mxu1 %v2187_v59 }
 0x11c   :  { %1648 = vmatpush3.msra.mxu0 %v2444_v19  ;;  %1701 = vmatprep.mubr.f32.mxu1 %v2272_v8 }
 0x11d   :  { %1649 = vmatprep.subr.mxu0 %v2445_v22 }
 0x11e   :  { %1650 = vmatpush3.msra.mxu0 %v2445_v22 }
 0x11f   :  { %1652 = vmatmul.mubr.f32.vlgmr.msra.gmra.mxu0 %v2442_v17  ;;  %1702 = vmatmul.mubr.f32.gmra.mxu1 %v2264_v53 }
 0x120   :  { %1654 = vmatprep.mubr.f32.mxu0 %v2208_v43  ;;  %1704 = vmatprep.mubr.f32.mxu1 %v2299_v5 }
 0x123   :  { %1655 = vmatmul.mubr.f32.gmra.mxu0 %v2187_v59  ;;  %1705 = vmatmul.mubr.f32.gmra.mxu1 %v2306_v58 }
 0x124   :  { %1657 = vmatprep.mubr.f32.mxu0 %v2272_v8 }
 0x127   :  { %1658 = vmatmul.mubr.f32.gmra.mxu0 %v2264_v53 }
 0x128   :  { %1660 = vmatprep.mubr.f32.mxu0 %v2299_v5 }
 0x12b   :  { %1661 = vmatmul.mubr.f32.gmra.mxu0 %v2306_v58 }
 0x166   :  { %v1521_v23 = vpop.f32.mrf.mxu1 }
 0x168   :  { %v608_v29 = vpop.f32.mrf.mxu1 }
 0x16e   :  { %v1477_v32 = vpop.f32.mrf.mxu0 }
 0x16f   :  { %v615_v61 = vadd.f32 %v1521_v23, %v1477_v32 }
 0x170   :  { %v387_v34 = vpop.f32.mrf.mxu0 }
 0x171   :  { %v609_v8 = vadd.f32 %v608_v29, %v387_v34 }
 0x183   :  { %v1524_v31 = vpop.f32.mrf.mxu1 }
 0x185   :  { %v620_v33 = vpop.f32.mrf.mxu1 }
 0x18b   :  { %v1480_v42 = vpop.f32.mrf.mxu0 }
 0x18c   :  { %v627_v1 = vadd.f32 %v1524_v31, %v1480_v42 }
 0x18d   :  { %v407_v51 = vpop.f32.mrf.mxu0 }
 0x18e   :  { %v621_v45 = vadd.f32 %v620_v33, %v407_v51 }
 0x19b   :  { %v1527_v41 = vpop.f32.mrf.mxu1 }
 0x19d   :  { %v632_v49 = vpop.f32.mrf.mxu1 }
 0x1a3   :  { %v1483_v60 = vpop.f32.mrf.mxu0 }
 0x1a4   :  { %v639_v21 = vadd.f32 %v1527_v41, %v1483_v60 }
 0x1a5   :  { %v427_v4 = vpop.f32.mrf.mxu0 }
 0x1a6   :  { %v633_v0 = vadd.f32 %v632_v49, %v427_v4 }
 0x1ad   :  { %v1530_v55 = vpop.f32.mrf.mxu1 }
 0x1af   :  { %v644_v62 = vpop.f32.mrf.mxu1 }
 0x1b1   :  { %v1609_v6 = vpop.f32.mrf.mxu1 }
 0x1b3   :  { %v892_v15 = vpop.f32.mrf.mxu1 }
 0x1b5   :  { %v1486_v13 = vpop.f32.mrf.mxu0 }
 0x1b6   :  { %v1612_v38 = vpop.f32.mrf.mxu1  ;;  %v651_v20 = vadd.f32 %v1530_v55, %v1486_v13 }
 0x1b7   :  { %v447_v35 = vpop.f32.mrf.mxu0 }
 0x1b8   :  { %v908_v47 = vpop.f32.mrf.mxu1  ;;  %v645_v19 = vadd.f32 %v644_v62, %v447_v35 }
 0x1b9   :  { %v1565_v40 = vpop.f32.mrf.mxu0 }
 0x1ba   :  { %v1615_v9 = vpop.f32.mrf.mxu1  ;;  %v762_v14 = vadd.f32 %v1565_v40, %v615_v61 }
 0x1bb   :  { %v754_v57 = vpop.f32.mrf.mxu0 }
 0x1bc   :  { %v924_v3 = vpop.f32.mrf.mxu1  ;;  %v755_v63 = vadd.f32 %v754_v57, %v609_v8  ;;  %v901_v12 = vadd.f32 %v1609_v6, %v762_v14 }
 0x1be   :  { %v893_v27 = vadd.f32 %v892_v15, %v755_v63 }
 0x1c0   :  { %v1568_v50 = vpop.f32.mrf.mxu0  ;;  %v1618_v59 = vpop.f32.mrf.mxu1 }
 0x1c1   :  { %v776_v5 = vadd.f32 %v1568_v50, %v627_v1 }
 0x1c2   :  { %v768_v39 = vpop.f32.mrf.mxu0  ;;  %v940_v43 = vpop.f32.mrf.mxu1 }
 0x1c3   :  { %v769_v37 = vadd.f32 %v768_v39, %v621_v45  ;;  %v917_v10 = vadd.f32 %v1612_v38, %v776_v5 }
 0x1c5   :  { %v909_v18 = vadd.f32 %v908_v47, %v769_v37 }
 0x1c6   :  { %v1571_v11 = vpop.f32.mrf.mxu0 }
 0x1c7   :  { %v790_v58 = vadd.f32 %v1571_v11, %v639_v21 }
 0x1c8   :  { %v782_v52 = vpop.f32.mrf.mxu0 }
 0x1c9   :  { %v783_v56 = vadd.f32 %v782_v52, %v633_v0  ;;  %v933_v32 = vadd.f32 %v1615_v9, %v790_v58 }
 0x1cb   :  { %v1574_v53 = vpop.f32.mrf.mxu0  ;;  %v925_v51 = vadd.f32 %v924_v3, %v783_v56 }
 0x1cc   :  { %v804_v23 = vadd.f32 %v1574_v53, %v651_v20 }
 0x1cd   :  { %v796_v7 = vpop.f32.mrf.mxu0 }
 0x1ce   :  { %v797_v41 = vadd.f32 %v796_v7, %v645_v19  ;;  %v949_v6 = vadd.f32 %v1618_v59, %v804_v23 }
 0x1d0   :  { %v941_v38 = vadd.f32 %v940_v43, %v797_v41 }
 0x1d7   :  { %v1697_v54 = vpop.f32.mrf.mxu1 }
 0x1d9   :  { %v1196_v24 = vpop.f32.mrf.mxu1 }
 0x1db   :  { %v1700_v25 = vpop.f32.mrf.mxu1 }
 0x1dd   :  { %v1208_v26 = vpop.f32.mrf.mxu1 }
 0x1df   :  { %v1653_v2 = vpop.f32.mrf.mxu0  ;;  %v1703_v36 = vpop.f32.mrf.mxu1 }
 0x1e0   :  { %v1074_v46 = vadd.f32 %v1653_v2, %v901_v12 }
 0x1e1   :  { %v1067_v48 = vpop.f32.mrf.mxu0  ;;  %v1220_v33 = vpop.f32.mrf.mxu1 }
 0x1e2   :  { %v1203_v30 = vadd.f32 %v1697_v54, %v1074_v46  ;;  %v1068_v28 = vadd.f32 %v1067_v48, %v893_v27 }
 0x1e3   :  { %v1656_v44 = vpop.f32.mrf.mxu0  ;;  %v1706_v13 = vpop.f32.mrf.mxu1 }
 0x1e4   :  { %1243 = vst [vmem:[#allocation5 + $0x8] sm:$0xff] %v1203_v30  ;;  %v1197_v16 = vadd.f32 %v1196_v24, %v1068_v28  ;;  %v1086_v17 = vadd.f32 %v1656_v44, %v917_v10 }
 0x1e5   :  { %v1079_v22 = vpop.f32.mrf.mxu0  ;;  %v1232_v9 = vpop.f32.mrf.mxu1 }
 0x1e6   :  { %1242 = vst [vmem:[#allocation5] sm:$0xff] %v1197_v16  ;;  %v1215_v29 = vadd.f32 %v1700_v25, %v1086_v17  ;;  %v1080_v31 = vadd.f32 %v1079_v22, %v909_v18 }
 0x1e7   :  { %v1659_v34 = vpop.f32.mrf.mxu0 }
 0x1e8   :  { %1245 = vst [vmem:[#allocation5 + $0x18] sm:$0xff] %v1215_v29  ;;  %v1209_v42 = vadd.f32 %v1208_v26, %v1080_v31  ;;  %v1098_v49 = vadd.f32 %v1659_v34, %v933_v32 }
 0x1e9   :  { %v1091_v55 = vpop.f32.mrf.mxu0 }
 0x1ea   :  { %1244 = vst [vmem:[#allocation5 + $0x10] sm:$0xff] %v1209_v42  ;;  %v1227_v60 = vadd.f32 %v1703_v36, %v1098_v49  ;;  %v1092_v4 = vadd.f32 %v1091_v55, %v925_v51 }
 0x1eb   :  { %v1662_v62 = vpop.f32.mrf.mxu0 }
 0x1ec   :  { %1247 = vst [vmem:[#allocation5 + $0x28] sm:$0xff] %v1227_v60  ;;  %v1221_v15 = vadd.f32 %v1220_v33, %v1092_v4  ;;  %v1110_v35 = vadd.f32 %v1662_v62, %v949_v6 }
 0x1ed   :  { %v1103_v40 = vpop.f32.mrf.mxu0 }
 0x1ee   :  { %1246 = vst [vmem:[#allocation5 + $0x20] sm:$0xff] %v1221_v15  ;;  %v1239_v47 = vadd.f32 %v1706_v13, %v1110_v35  ;;  %v1104_v57 = vadd.f32 %v1103_v40, %v941_v38 }
 0x1f0   :  { %1249 = vst [vmem:[#allocation5 + $0x38] sm:$0xff] %v1239_v47  ;;  %v1233_v50 = vadd.f32 %v1232_v9, %v1104_v57 }
 0x1f2   :  { %1248 = vst [vmem:[#allocation5 + $0x30] sm:$0xff] %v1233_v50 }
 0x1f3   :  { %1767 = shalt.err (!%p1764_p9)
}
 0x1f4   :  { %1261 = dma.vmem_to_hbm [thread:$0]  %s1256_s3, 1024, %s2412_s2, [#allocation4], %s1781_s12, %s1781_s12, %s1782_s13  }
 0x1f5   :  { %1778 = dma.done.wait [#allocation4], 1024  }
 0x1f6   :  { %1779 = vsyncadd [#allocation4], 4294966272 }
 0x1f7   :  { %1265 = vsyncpa [#allocation3], 1 }
 0x1f8   :  { %1266 = vsyncpa [#allocation4], 1 }

</bundles_post_ra>
